<compile_context>
chip_gen: v6e
topology: v6e:2x2x1
jax: 0.10.0
libtpu: 0.0.40
codegen_flags: <defaults>
</compile_context>

<pallas_src>
import math
from functools import partial

import jax
import jax.numpy as jnp
from jax.experimental import pallas as pl
from jax.experimental.pallas import tpu as pltpu

INV_SQRT2 = 1.0 / math.sqrt(2.0)
_LANE = 128
_MAX_FOLD_LANES = 4096  # cap on folded row width (g*H) to keep rows sane


def _detect_phys_vmem_bytes():
    try:
        info = pltpu.get_tpu_info()
        cap = getattr(info, "vmem_capacity_bytes", None)
        if cap:
            return int(cap)
    except Exception:
        pass
    # Most conservative per-TC VMEM across supported generations (v7x: 64 MiB).
    return 64 * 1024 * 1024


_PHYS_VMEM_BYTES = _detect_phys_vmem_bytes()
# Explicit scoped-VMEM limit we request from Mosaic: raises v5e's 16 MiB
# default, matches v6e/v7x's 32 MiB default, never more than half of physical.
_VMEM_LIMIT_BYTES = int(min(32 * 1024 * 1024, _PHYS_VMEM_BYTES // 2))
# Tile-sizing budget: half the limit, leaving headroom for Mosaic scratch
# (relayouts on the unaligned-H path) on top of the double-buffered blocks.
_TILE_VMEM_BUDGET = _VMEM_LIMIT_BYTES // 2
# Aim for ~4 MiB of HBM traffic per grid step (streaming kernels reach ~85% of
# HBM roofline at 1-4 MiB blocks vs ~30% at tiny blocks).
_STEP_BYTES_TARGET = 4 * 1024 * 1024
# Keep at least this many row-grid steps when the problem is big enough so
# v7x's two TensorCores both get work and the DMA pipeline stays primed.
_MIN_ROW_STEPS = 4


def _sublane_granule(itemsize):
    # 8 sublanes of 32-bit words per vreg tile; packed granule grows for
    # narrow dtypes (16 rows for bf16, 32 for int8/fp8).
    return max(8, 32 // max(1, itemsize))


def _row_tile(n_rows, lane_width, itemsize):
    """Rows per grid step for blocks that are `lane_width` output lanes wide."""
    per_row_bytes = 4 * lane_width * itemsize            # even + odd + cA + cD
    t = max(1, _STEP_BYTES_TARGET // per_row_bytes)      # bytes-based target
    t = min(t, max(1, _TILE_VMEM_BUDGET // (2 * per_row_bytes)))  # double buffer
    granule = _sublane_granule(itemsize)
    if n_rows >= _MIN_ROW_STEPS * granule:
        # Keep >= _MIN_ROW_STEPS steps on the 'parallel' row axis (v7x 2 TCs).
        t = min(t, -(-n_rows // _MIN_ROW_STEPS))
    t = min(t, n_rows)
    if n_rows >= granule:
        t = max(granule, (t // granule) * granule)
    else:
        t = n_rows
    return t


def _lane_tile(hidden, itemsize):
    """Largest multiple-of-128 divisor of `hidden` whose block set fits VMEM
    even at the minimum row tile (bounds VMEM independently of H)."""
    granule = _sublane_granule(itemsize)

    def fits(width):
        return 8 * granule * width * itemsize <= _TILE_VMEM_BUDGET

    if fits(hidden):
        return hidden
    m = hidden // _LANE
    best = _LANE
    for d in range(1, m + 1):
        if m % d == 0 and fits(_LANE * d):
            best = max(best, _LANE * d)
    return best


def _fold_factor(n_pairs, hidden):
    """Number of sequence pairs folded per row so g*H is a multiple of 128."""
    if hidden % _LANE == 0:
        return 1
    g = _LANE // math.gcd(hidden, _LANE)  # smallest g with (g*H) % 128 == 0
    if g > 1 and n_pairs % g == 0 and g * hidden <= _MAX_FOLD_LANES:
        return g
    # TODO(synk): when the fold factor does not divide B*S//2 we fall back to
    # the unfolded (masked-store) path; a remainder-handling split would keep
    # lane-dense stores for the bulk of the rows.
    return 1


def _dwt_split_kernel(even_ref, odd_ref, ca_ref, cd_ref):
    # Blocks: even/odd (tR, tW) lane-dense; compute in f32, store in out dtype.
    even = even_ref[...].astype(jnp.float32)
    odd = odd_ref[...].astype(jnp.float32)
    ca_ref[...] = ((even + odd) * INV_SQRT2).astype(ca_ref.dtype)
    cd_ref[...] = ((even - odd) * INV_SQRT2).astype(cd_ref.dtype)


def _dwt_folded_kernel(x_ref, ca_ref, cd_ref, *, g, h):
    # x block: (tR, 2*g*h); pair j's even lanes at [2j*h, (2j+1)*h),
    # odd lanes at [(2j+1)*h, (2j+2)*h). Output blocks are (tR, g*h),
    # lane-dense when g*h is a multiple of 128. Static slices/concat land on
    # the XLU, which has plenty of slack in this HBM-bound kernel.
    x = x_ref[...].astype(jnp.float32)
    ca_parts, cd_parts = [], []
    for j in range(g):
        even = x[:, (2 * j) * h:(2 * j + 1) * h]
        odd = x[:, (2 * j + 1) * h:(2 * j + 2) * h]
        ca_parts.append(even + odd)
        cd_parts.append(even - odd)
    ca = ca_parts[0] if g == 1 else jnp.concatenate(ca_parts, axis=-1)
    cd = cd_parts[0] if g == 1 else jnp.concatenate(cd_parts, axis=-1)
    ca_ref[...] = (ca * INV_SQRT2).astype(ca_ref.dtype)
    cd_ref[...] = (cd * INV_SQRT2).astype(cd_ref.dtype)


def _dwt_lane_aligned(x_rows, n_pairs, hidden):
    """H % 128 == 0 path: even/odd halves as two lane-tiled inputs."""
    itemsize = x_rows.dtype.itemsize
    tw = _lane_tile(hidden, itemsize)
    tr = _row_tile(n_pairs, tw, itemsize)
    grid = (pl.cdiv(n_pairs, tr), hidden // tw)
    odd_off = hidden // tw
    out_shape = (jax.ShapeDtypeStruct((n_pairs, hidden), x_rows.dtype),) * 2
    return pl.pallas_call(
        _dwt_split_kernel,
        out_shape=out_shape,
        grid=grid,
        in_specs=[
            pl.BlockSpec((tr, tw), lambda r, j: (r, j)),
            pl.BlockSpec((tr, tw), lambda r, j, _o=odd_off: (r, _o + j)),
        ],
        out_specs=[
            pl.BlockSpec((tr, tw), lambda r, j: (r, j)),
            pl.BlockSpec((tr, tw), lambda r, j: (r, j)),
        ],
        compiler_params=pltpu.CompilerParams(
            dimension_semantics=("parallel", "parallel"),
            vmem_limit_bytes=_VMEM_LIMIT_BYTES,
        ),
    )(x_rows, x_rows)


def _dwt_folded(x_rows, n_rows, g, hidden):
    """H % 128 != 0 path: g pairs folded per row for lane-dense outputs."""
    itemsize = x_rows.dtype.itemsize
    width = g * hidden
    tr = _row_tile(n_rows, width, itemsize)
    grid = (pl.cdiv(n_rows, tr),)
    out_shape = (jax.ShapeDtypeStruct((n_rows, width), x_rows.dtype),) * 2
    return pl.pallas_call(
        partial(_dwt_folded_kernel, g=g, h=hidden),
        out_shape=out_shape,
        grid=grid,
        in_specs=[pl.BlockSpec((tr, 2 * width), lambda r: (r, 0))],
        out_specs=[
            pl.BlockSpec((tr, width), lambda r: (r, 0)),
            pl.BlockSpec((tr, width), lambda r: (r, 0)),
        ],
        compiler_params=pltpu.CompilerParams(
            dimension_semantics=("parallel",),
            vmem_limit_bytes=_VMEM_LIMIT_BYTES,
        ),
    )(x_rows)


def _dwt_calculation_haar_impl(x):
    """Haar DWT along axis=1 of x (B, S, H) -> (cA, cD) each (B, S//2, H)."""
    B, S, H = x.shape
    if S % 2 != 0:
        # TODO(synk): odd S needs pywt's symmetric boundary padding.
        raise NotImplementedError("even sequence length required for Haar DWT kernel")
    S2 = S // 2
    R = B * S2  # flattened (batch, pair) rows; pairs never straddle batches (S even)

    if H % _LANE == 0:
        x_rows = x.reshape(R, 2 * H)                 # free bitcast under jit
        ca, cd = _dwt_lane_aligned(x_rows, R, H)
    else:
        g = _fold_factor(R, H)
        x_rows = x.reshape(R // g, 2 * g * H)        # free bitcast under jit
        ca, cd = _dwt_folded(x_rows, R // g, g, H)

    return ca.reshape(B, S2, H), cd.reshape(B, S2, H)


# jit the wrapper so the reshapes fuse to bitcasts around the pallas_call.
dwt_calculation_haar = jax.jit(_dwt_calculation_haar_impl)


def _dwt_haar_reference(x):
    xf = x.astype(jnp.float32)
    even = xf[:, 0::2, :]
    odd = xf[:, 1::2, :]
    return (even + odd) * INV_SQRT2, (even - odd) * INV_SQRT2


if __name__ == "__main__":
    key = jax.random.PRNGKey(0)
    k0, k1, k2, k3 = jax.random.split(key, 4)

    # Shape implied by the module forward: (batch=2, seq=8, hidden=32),
    # DWT taken along the sequence axis (axis=1). Exercises the folded path.
    x = jax.random.normal(k0, (2, 8, 32), dtype=jnp.float32)
    ca, cd = dwt_calculation_haar(x)
    jax.block_until_ready((ca, cd))
    ca_ref, cd_ref = _dwt_haar_reference(x)
    assert ca.shape == (2, 4, 32) and cd.shape == (2, 4, 32)
    assert jnp.allclose(ca, ca_ref, atol=1e-6, rtol=1e-6)
    assert jnp.allclose(cd, cd_ref, atol=1e-6, rtol=1e-6)

    # Lane-aligned H: even/odd split path with a multi-step row grid.
    x2 = jax.random.normal(k1, (2, 64, 128), dtype=jnp.float32)
    ca2, cd2 = dwt_calculation_haar(x2)
    ca2_ref, cd2_ref = _dwt_haar_reference(x2)
    assert jnp.allclose(ca2, ca2_ref, atol=1e-6, rtol=1e-6)
    assert jnp.allclose(cd2, cd2_ref, atol=1e-6, rtol=1e-6)

    # bf16 path: f32 in-register compute, bf16 stores (dtype preserved).
    x3 = jax.random.normal(k2, (2, 64, 128), dtype=jnp.bfloat16)
    ca3, cd3 = dwt_calculation_haar(x3)
    ca3_ref, cd3_ref = _dwt_haar_reference(x3)
    assert ca3.dtype == jnp.bfloat16 and cd3.dtype == jnp.bfloat16
    assert jnp.allclose(ca3.astype(jnp.float32), ca3_ref, atol=1e-2, rtol=1e-2)
    assert jnp.allclose(cd3.astype(jnp.float32), cd3_ref, atol=1e-2, rtol=1e-2)

    # Unaligned H where the fold factor doesn't divide R: g=1 fallback path.
    x4 = jax.random.normal(k3, (2, 6, 48), dtype=jnp.float32)
    ca4, cd4 = dwt_calculation_haar(x4)
    ca4_ref, cd4_ref = _dwt_haar_reference(x4)
    assert jnp.allclose(ca4, ca4_ref, atol=1e-6, rtol=1e-6)
    assert jnp.allclose(cd4, cd4_ref, atol=1e-6, rtol=1e-6)

    print("KERNEL_OK")
</pallas_src>

<mosaic_0001>
module attributes {stable_mosaic.version = 11 : i64} {
  func.func @_dwt_folded_kernel(%arg0: i32, %arg1: memref<2x256xf32, #tpu.memory_space<vmem>>, %arg2: memref<2x128xf32, #tpu.memory_space<vmem>>, %arg3: memref<2x128xf32, #tpu.memory_space<vmem>>) attributes {dimension_semantics = [#tpu.dimension_semantics<parallel>], iteration_bounds = array<i64: 1>, scalar_prefetch = 0 : i64, scratch_operands = 0 : i64, tpu.core_type = #tpu.core_type<tc>, window_params = [{transform_indices = @transform_0, window_bounds = array<i64: 2, 256>}, {transform_indices = @transform_1, window_bounds = array<i64: 2, 128>}, {transform_indices = @transform_2, window_bounds = array<i64: 2, 128>}]} {
    %c0 = arith.constant 0 : index
    %c0_0 = arith.constant 0 : index
    %0 = vector.load %arg1[%c0, %c0_0] : memref<2x256xf32, #tpu.memory_space<vmem>>, vector<2x256xf32>
    %1 = vector.extract_strided_slice %0 {offsets = [0, 0], sizes = [2, 32], strides = [1, 1]} : vector<2x256xf32> to vector<2x32xf32>
    %2 = vector.extract_strided_slice %0 {offsets = [0, 32], sizes = [2, 32], strides = [1, 1]} : vector<2x256xf32> to vector<2x32xf32>
    %3 = arith.addf %1, %2 : vector<2x32xf32>
    %4 = arith.subf %1, %2 : vector<2x32xf32>
    %5 = vector.extract_strided_slice %0 {offsets = [0, 64], sizes = [2, 32], strides = [1, 1]} : vector<2x256xf32> to vector<2x32xf32>
    %6 = vector.extract_strided_slice %0 {offsets = [0, 96], sizes = [2, 32], strides = [1, 1]} : vector<2x256xf32> to vector<2x32xf32>
    %7 = arith.addf %5, %6 : vector<2x32xf32>
    %8 = arith.subf %5, %6 : vector<2x32xf32>
    %9 = vector.extract_strided_slice %0 {offsets = [0, 128], sizes = [2, 32], strides = [1, 1]} : vector<2x256xf32> to vector<2x32xf32>
    %10 = vector.extract_strided_slice %0 {offsets = [0, 160], sizes = [2, 32], strides = [1, 1]} : vector<2x256xf32> to vector<2x32xf32>
    %11 = arith.addf %9, %10 : vector<2x32xf32>
    %12 = arith.subf %9, %10 : vector<2x32xf32>
    %13 = vector.extract_strided_slice %0 {offsets = [0, 192], sizes = [2, 32], strides = [1, 1]} : vector<2x256xf32> to vector<2x32xf32>
    %14 = vector.extract_strided_slice %0 {offsets = [0, 224], sizes = [2, 32], strides = [1, 1]} : vector<2x256xf32> to vector<2x32xf32>
    %15 = arith.addf %13, %14 : vector<2x32xf32>
    %16 = arith.subf %13, %14 : vector<2x32xf32>
    %17 = tpu.concatenate %3, %7, %11, %15 in 1 : vector<2x32xf32>, vector<2x32xf32>, vector<2x32xf32>, vector<2x32xf32> -> vector<2x128xf32>
    %18 = tpu.concatenate %4, %8, %12, %16 in 1 : vector<2x32xf32>, vector<2x32xf32>, vector<2x32xf32>, vector<2x32xf32> -> vector<2x128xf32>
    %cst = arith.constant 0.707106769 : f32
    %19 = vector.broadcast %cst : f32 to vector<2x128xf32>
    %20 = arith.mulf %17, %19 : vector<2x128xf32>
    %c0_1 = arith.constant 0 : index
    %c0_2 = arith.constant 0 : index
    %21 = vector.load %arg2[%c0_1, %c0_2] : memref<2x128xf32, #tpu.memory_space<vmem>>, vector<2x128xf32>
    tpu.vector_store %arg2[%c0_1, %c0_2], %20 {strides = array<i32>} : memref<2x128xf32, #tpu.memory_space<vmem>>, vector<2x128xf32>,
    %cst_3 = arith.constant 0.707106769 : f32
    %22 = vector.broadcast %cst_3 : f32 to vector<2x128xf32>
    %23 = arith.mulf %18, %22 : vector<2x128xf32>
    %c0_4 = arith.constant 0 : index
    %c0_5 = arith.constant 0 : index
    %24 = vector.load %arg3[%c0_4, %c0_5] : memref<2x128xf32, #tpu.memory_space<vmem>>, vector<2x128xf32>
    tpu.vector_store %arg3[%c0_4, %c0_5], %23 {strides = array<i32>} : memref<2x128xf32, #tpu.memory_space<vmem>>, vector<2x128xf32>,
    return
  }
  func.func @transform_0(%arg0: i32) -> (i32, i32) {
    %c0_i32 = arith.constant 0 : i32
    %c0_i32_0 = arith.constant 0 : i32
    return %arg0, %c0_i32 : i32, i32
  }
  func.func @transform_1(%arg0: i32) -> (i32, i32) {
    %c0_i32 = arith.constant 0 : i32
    %c0_i32_0 = arith.constant 0 : i32
    return %arg0, %c0_i32 : i32, i32
  }
  func.func @transform_2(%arg0: i32) -> (i32, i32) {
    %c0_i32 = arith.constant 0 : i32
    %c0_i32_0 = arith.constant 0 : i32
    return %arg0, %c0_i32 : i32, i32
  }
}

</mosaic_0001>

<bundles_post_ra>
// kernel: _dwt_calculation_haar_impl.1
= control target key start
LH: loop header
LB: loop body
LE: loop exit
PB: predicated region body
PF: predicated region fallthrough
CT: control target
= control target key end

     0   :  { %s124_s11 = smov 96   ;;  %s125_s12 = smov 32   ;;  %v127_v1 = vmov 1983009808   ;;  %v37_v3 = vlaneseq  ;;  %vm66_vm0 = vcmask 261120   ;;  %vm68_vm1 = vcmask 523264   ;;  %s157_s0 = inlined_call_operand.vmem [shape: f32[2,256], index: 0, kind: input, shape index: {}]   ;;  %s158_s2 = inlined_call_operand.vmem [shape: f32[2,128], index: 2, kind: output, shape index: {1}]   ;;  %s159_s1 = inlined_call_operand.vmem [shape: f32[2,128], index: 1, kind: output, shape index: {0}]  }
   0x1   :  { %v10_v0 = vld [vmem:[%s157_s0] sm:$0xf]  ;;  %s126_s13 = smov 64   ;;  %v35_v2 = vunpack.c.l.s4 %v127_v1  ;;  %vm70_vm2 = vcmask 785408  }
   0x2   :  { %12 = vrot.lane.b32.xlu0 %v10_v0, %s124_s11  ;;  %27 = vrot.lane.b32.xlu1 %v10_v0, %s125_s12  ;;  %v38_v5 = vshrl.u32 %v37_v3, 7  ;;  %v17_v6 = vrot.slane %v10_v0, 2 }
   0x3   :  { %v36_v4 = vunpack.c.0.s8 %v35_v2 }
   0x5   :  { %v39_v7 = vsub.s32 %v36_v4, %v38_v5 }
   0x6   :  { %23 = vrot.lane.b32.xlu0 %v10_v0, %s126_s13 }
  0x74   :  { %v13_v8 = vpop.permute.xlu0 %12  ;;  %v28_v9 = vpop.permute.xlu1 %27 }
  0x75   :  { %v15_v10 = vadd.f32 %v13_v8, %v10_v0  ;;  %v16_v11 = vsub.f32 %v10_v0, %v13_v8  ;;  %v19_v12 = vrot.slane %v13_v8, 2  ;;  %v29_v13 = vrot.slane %v28_v9, 2 }
  0x77   :  { %v21_v14 = vadd.f32 %v19_v12, %v17_v6  ;;  %v22_v15 = vsub.f32 %v17_v6, %v19_v12  ;;  %v40_v16 = vrot.slane %v15_v10, %v39_v7  ;;  %v79_v17 = vrot.slane %v16_v11, %v39_v7 }
  0x78   :  { %v24_v18 = vpop.permute.xlu0 %23 }
  0x79   :  { %41 = vrot.lane.b32.xlu1 %v40_v16, %s124_s11  ;;  %80 = vrot.lane.b32.xlu0 %v79_v17, %s124_s11  ;;  %v25_v19 = vrot.slane %v24_v18, 2  ;;  %v90_v22 = vrot.slane %v22_v15, %v39_v7  ;;  %v51_v23 = vrot.slane %v21_v14, %v39_v7 }
  0x7b   :  { %v31_v20 = vadd.f32 %v29_v13, %v25_v19  ;;  %v32_v21 = vsub.f32 %v25_v19, %v29_v13 }
  0x7d   :  { %91 = vrot.lane.b32.xlu0 %v90_v22, %s126_s13  ;;  %52 = vrot.lane.b32.xlu1 %v51_v23, %s126_s13  ;;  %v101_v24 = vrot.slane %v32_v21, %v39_v7  ;;  %v62_v25 = vrot.slane %v31_v20, %v39_v7 }
  0x81   :  { %102 = vrot.lane.b32.xlu0 %v101_v24, %s124_s11  ;;  %63 = vrot.lane.b32.xlu1 %v62_v25, %s124_s11 }
  0xeb   :  { %v42_v26 = vpop.permute.xlu1 %41  ;;  %v81_v27 = vpop.permute.xlu0 %80 }
  0xec   :  { %v67_v30 = vsel %vm66_vm0, %v15_v10, %v42_v26  ;;  %v105_v31 = vsel %vm66_vm0, %v16_v11, %v81_v27 }
  0xef   :  { %v92_v28 = vpop.permute.xlu0 %91  ;;  %v53_v29 = vpop.permute.xlu1 %52 }
  0xf0   :  { %v106_v32 = vsel %vm68_vm1, %v105_v31, %v92_v28  ;;  %v69_v33 = vsel %vm68_vm1, %v67_v30, %v53_v29 }
  0xf3   :  { %v103_v34 = vpop.permute.xlu0 %102  ;;  %v64_v35 = vpop.permute.xlu1 %63 }
  0xf4   :  { %v107_v36 = vsel %vm70_vm2, %v106_v32, %v103_v34  ;;  %v71_v37 = vsel %vm70_vm2, %v69_v33, %v64_v35 }
  0xf5   :  { %v110_v38 = vmul.f32 0.70710677, %v107_v36  ;;  %v108_v39 = vmul.f32 0.70710677, %v71_v37 }
  0xf7   :  { %111 = vst [vmem:[%s158_s2] sm:$0x3] %v110_v38  ;;  %109 = vst [vmem:[%s159_s1] sm:$0x3] %v108_v39 }

</bundles_post_ra>
